<compile_context>
chip_gen: v5e
topology: v5e:2x2
jax: 0.10.0
libtpu: 0.0.40
codegen_flags: <defaults>
</compile_context>

<pallas_src>
import jax
import jax.numpy as jnp
from jax.experimental import pallas as pl
from jax.experimental.pallas import tpu as pltpu


def skipgram_kernel(cen_ids_ref, ctx_ids_ref, in_tab_ref, out_tab_ref, o_ref):
    TB = cen_ids_ref.shape[0]          # batch-tile rows (sublane aligned)
    C = o_ref.shape[1]                 # context size
    V, D = in_tab_ref.shape            # vocab size, embedding dim

    # --- gather center embeddings: one-hot(TB, V) @ in_table(V, D)  (MXU, exact)
    cen_ids = cen_ids_ref[...]                                       # (TB, 1) i32
    lane_v = jax.lax.broadcasted_iota(jnp.int32, (TB, V), 1)
    cen_onehot = jnp.where(lane_v == cen_ids, 1.0, 0.0).astype(jnp.float32)
    cen_vec = jnp.dot(cen_onehot, in_tab_ref[...],
                      preferred_element_type=jnp.float32)            # (TB, D)

    # --- gather context embeddings: one-hot(TB*C, V) @ out_table(V, D)
    ctx_ids = ctx_ids_ref[...]                                       # (TB*C, 1) i32
    lane_v2 = jax.lax.broadcasted_iota(jnp.int32, (TB * C, V), 1)
    ctx_onehot = jnp.where(lane_v2 == ctx_ids, 1.0, 0.0).astype(jnp.float32)
    ctx_vec = jnp.dot(ctx_onehot, out_tab_ref[...],
                      preferred_element_type=jnp.float32)            # (TB*C, D)
    ctx_vec = ctx_vec.reshape(TB, C, D)                              # lane dim kept

    # --- scores[b, c] = <context_vec[b, c], center_vec[b]>  (vectorized VPU+XLU)
    scores = jnp.sum(ctx_vec * cen_vec[:, None, :], axis=-1)         # (TB, C) f32

    # --- log_softmax over the context axis
    m = jnp.max(scores, axis=1, keepdims=True)
    e = jnp.exp(scores - m)
    lse = jnp.log(jnp.sum(e, axis=1, keepdims=True)) + m
    o_ref[...] = (scores - lse).astype(o_ref.dtype)


def skipgram_forward(center, context, in_emb, out_emb, *, batch_tile=8):
    (B,) = center.shape
    _, C = context.shape
    V, D = in_emb.shape

    # pad batch to a multiple of the sublane-aligned tile (index 0 = padding row)
    TB = batch_tile
    B_pad = ((B + TB - 1) // TB) * TB
    if B_pad != B:
        center = jnp.pad(center, (0, B_pad - B))
        context = jnp.pad(context, ((0, B_pad - B), (0, 0)))

    cen_ids = center.astype(jnp.int32).reshape(B_pad, 1)
    ctx_ids = context.astype(jnp.int32).reshape(B_pad * C, 1)

    grid_spec = pltpu.PrefetchScalarGridSpec(
        num_scalar_prefetch=0,
        grid=(B_pad // TB,),
        in_specs=[
            pl.BlockSpec((TB, 1), lambda i: (i, 0)),          # center id tile
            pl.BlockSpec((TB * C, 1), lambda i: (i, 0)),      # context id tile
            pl.BlockSpec((V, D), lambda i: (0, 0)),           # full in_embedding (VMEM-resident)
            pl.BlockSpec((V, D), lambda i: (0, 0)),           # full out_embedding (VMEM-resident)
        ],
        out_specs=pl.BlockSpec((TB, C), lambda i: (i, 0)),    # sublane-dense output slab
    )

    out = pl.pallas_call(
        skipgram_kernel,
        out_shape=jax.ShapeDtypeStruct((B_pad, C), jnp.float32),
        grid_spec=grid_spec,
        compiler_params=pltpu.CompilerParams(
            dimension_semantics=("parallel",)),
    )(cen_ids, ctx_ids, in_emb, out_emb)
    return out[:B]


def skipgram_ref(center, context, in_emb, out_emb):
    # pure-JAX reference of the PyTorch forward
    cen = in_emb[center]                       # (B, D)
    ctx = out_emb[context]                     # (B, C, D)
    scores = jnp.einsum('bcd,bd->bc', ctx, cen)
    return jax.nn.log_softmax(scores, axis=1)  # log(softmax(dim=1)) over C


if __name__ == "__main__":
    B, C, V, D = 8, 8, 64, 128                 # batch, context size, vocab, embedding_dim
    key = jax.random.PRNGKey(0)
    k1, k2, k3, k4 = jax.random.split(key, 4)

    # nn.Embedding weights: row 0 (padding_idx) zeros, rest ~ U(-0.5/D, 0.5/D)
    bound = 0.5 / D
    in_emb = jnp.concatenate(
        [jnp.zeros((1, D), jnp.float32),
         jax.random.uniform(k1, (V - 1, D), jnp.float32, -bound, bound)], axis=0)
    out_emb = jnp.concatenate(
        [jnp.zeros((1, D), jnp.float32),
         jax.random.uniform(k2, (V - 1, D), jnp.float32, -bound, bound)], axis=0)

    center = jax.random.randint(k3, (B,), 0, V, jnp.int32)
    context = jax.random.randint(k4, (B, C), 0, V, jnp.int32)

    out = skipgram_forward(center, context, in_emb, out_emb)
    out = jax.block_until_ready(out)

    ref = skipgram_ref(center, context, in_emb, out_emb)
    assert out.shape == (B, C)
    assert jnp.allclose(out, ref, atol=1e-5, rtol=1e-5)
    print("KERNEL_OK")
</pallas_src>

<mosaic_0001>
module attributes {stable_mosaic.version = 11 : i64} {
  func.func @skipgram_kernel(%arg0: i32, %arg1: memref<8x1xi32, #tpu.memory_space<vmem>>, %arg2: memref<64x1xi32, #tpu.memory_space<vmem>>, %arg3: memref<64x128xf32, #tpu.memory_space<vmem>>, %arg4: memref<64x128xf32, #tpu.memory_space<vmem>>, %arg5: memref<8x8xf32, #tpu.memory_space<vmem>>) attributes {dimension_semantics = [#tpu.dimension_semantics<parallel>], iteration_bounds = array<i64: 1>, scalar_prefetch = 0 : i64, scratch_operands = 0 : i64, tpu.core_type = #tpu.core_type<tc>, window_params = [{transform_indices = @transform_0, window_bounds = array<i64: 8, 1>}, {transform_indices = @transform_1, window_bounds = array<i64: 64, 1>}, {pipeline_mode = #tpu.pipeline_mode<synchronous>, transform_indices = @transform_2, window_bounds = array<i64: 64, 128>}, {pipeline_mode = #tpu.pipeline_mode<synchronous>, transform_indices = @transform_3, window_bounds = array<i64: 64, 128>}, {transform_indices = @transform_4, window_bounds = array<i64: 8, 8>}]} {
    %c0 = arith.constant 0 : index
    %c0_0 = arith.constant 0 : index
    %0 = vector.load %arg1[%c0, %c0_0] : memref<8x1xi32, #tpu.memory_space<vmem>>, vector<8x1xi32>
    %1 = tpu.iota {dimensions = array<i32: 1>} : vector<8x64xi32>
    %2 = vector.broadcast %0 : vector<8x1xi32> to vector<8x64xi32>
    %3 = arith.cmpi eq, %1, %2 : vector<8x64xi32>
    %cst = arith.constant 1.000000e+00 : f32
    %cst_1 = arith.constant 0.000000e+00 : f32
    %4 = vector.broadcast %cst : f32 to vector<8x64xf32>
    %5 = vector.broadcast %cst_1 : f32 to vector<8x64xf32>
    %6 = arith.select %3, %4, %5 : vector<8x64xi1>, vector<8x64xf32>
    %c0_2 = arith.constant 0 : index
    %c0_3 = arith.constant 0 : index
    %7 = vector.load %arg3[%c0_2, %c0_3] : memref<64x128xf32, #tpu.memory_space<vmem>>, vector<64x128xf32>
    %cst_4 = arith.constant dense<0.000000e+00> : vector<8x128xf32>
    %8 = tpu.matmul %6, %7, %cst_4 {dimension_numbers = #tpu.dot_dimension_numbers<[1], [0], [0], [1], [0, 0, 1, 1], [], []>} : vector<8x64xf32>, vector<64x128xf32>, vector<8x128xf32> -> vector<8x128xf32>
    %c0_5 = arith.constant 0 : index
    %c0_6 = arith.constant 0 : index
    %9 = vector.load %arg2[%c0_5, %c0_6] : memref<64x1xi32, #tpu.memory_space<vmem>>, vector<64x1xi32>
    %10 = tpu.iota {dimensions = array<i32: 1>} : vector<64x64xi32>
    %11 = vector.broadcast %9 : vector<64x1xi32> to vector<64x64xi32>
    %12 = arith.cmpi eq, %10, %11 : vector<64x64xi32>
    %cst_7 = arith.constant 1.000000e+00 : f32
    %cst_8 = arith.constant 0.000000e+00 : f32
    %13 = vector.broadcast %cst_7 : f32 to vector<64x64xf32>
    %14 = vector.broadcast %cst_8 : f32 to vector<64x64xf32>
    %15 = arith.select %12, %13, %14 : vector<64x64xi1>, vector<64x64xf32>
    %c0_9 = arith.constant 0 : index
    %c0_10 = arith.constant 0 : index
    %16 = vector.load %arg4[%c0_9, %c0_10] : memref<64x128xf32, #tpu.memory_space<vmem>>, vector<64x128xf32>
    %cst_11 = arith.constant dense<0.000000e+00> : vector<64x128xf32>
    %17 = tpu.matmul %15, %16, %cst_11 {dimension_numbers = #tpu.dot_dimension_numbers<[1], [0], [0], [1], [0, 0, 1, 1], [], []>} : vector<64x64xf32>, vector<64x128xf32>, vector<64x128xf32> -> vector<64x128xf32>
    %18 = vector.shape_cast %17 : vector<64x128xf32> to vector<8x8x128xf32>
    %19 = vector.shape_cast %8 : vector<8x128xf32> to vector<8x1x128xf32>
    %20 = vector.broadcast %19 : vector<8x1x128xf32> to vector<8x8x128xf32>
    %21 = arith.mulf %18, %20 : vector<8x8x128xf32>
    %cst_12 = arith.constant dense<0.000000e+00> : vector<8x8xf32>
    %22 = vector.multi_reduction <add>, %21, %cst_12 [2] : vector<8x8x128xf32> to vector<8x8xf32>
    %cst_13 = arith.constant dense<0xFF800000> : vector<8xf32>
    %23 = vector.multi_reduction <maximumf>, %22, %cst_13 [1] : vector<8x8xf32> to vector<8xf32>
    %24 = vector.shape_cast %23 : vector<8xf32> to vector<8x1xf32>
    %25 = vector.broadcast %24 : vector<8x1xf32> to vector<8x8xf32>
    %26 = arith.subf %22, %25 : vector<8x8xf32>
    %27 = math.exp %26 : vector<8x8xf32>
    %cst_14 = arith.constant dense<0.000000e+00> : vector<8xf32>
    %28 = vector.multi_reduction <add>, %27, %cst_14 [1] : vector<8x8xf32> to vector<8xf32>
    %29 = vector.shape_cast %28 : vector<8xf32> to vector<8x1xf32>
    %30 = math.log %29 : vector<8x1xf32>
    %31 = arith.addf %30, %24 : vector<8x1xf32>
    %32 = vector.broadcast %31 : vector<8x1xf32> to vector<8x8xf32>
    %33 = arith.subf %22, %32 : vector<8x8xf32>
    %c0_15 = arith.constant 0 : index
    %c0_16 = arith.constant 0 : index
    %34 = vector.load %arg5[%c0_15, %c0_16] : memref<8x8xf32, #tpu.memory_space<vmem>>, vector<8x8xf32>
    tpu.vector_store %arg5[%c0_15, %c0_16], %33 {strides = array<i32>} : memref<8x8xf32, #tpu.memory_space<vmem>>, vector<8x8xf32>,
    return
  }
  func.func @transform_0(%arg0: i32) -> (i32, i32) {
    %c0_i32 = arith.constant 0 : i32
    %c0_i32_0 = arith.constant 0 : i32
    return %arg0, %c0_i32 : i32, i32
  }
  func.func @transform_1(%arg0: i32) -> (i32, i32) {
    %c0_i32 = arith.constant 0 : i32
    %c0_i32_0 = arith.constant 0 : i32
    return %arg0, %c0_i32 : i32, i32
  }
  func.func @transform_2(%arg0: i32) -> (i32, i32) {
    %c0_i32 = arith.constant 0 : i32
    %c0_i32_0 = arith.constant 0 : i32
    %c0_i32_1 = arith.constant 0 : i32
    return %c0_i32, %c0_i32_0 : i32, i32
  }
  func.func @transform_3(%arg0: i32) -> (i32, i32) {
    %c0_i32 = arith.constant 0 : i32
    %c0_i32_0 = arith.constant 0 : i32
    %c0_i32_1 = arith.constant 0 : i32
    return %c0_i32, %c0_i32_0 : i32, i32
  }
  func.func @transform_4(%arg0: i32) -> (i32, i32) {
    %c0_i32 = arith.constant 0 : i32
    %c0_i32_0 = arith.constant 0 : i32
    return %arg0, %c0_i32 : i32, i32
  }
}

</mosaic_0001>

<bundles_post_ra>
// kernel: tpu_custom_call.1
= control target key start
LH: loop header
LB: loop body
LE: loop exit
PB: predicated region body
PF: predicated region fallthrough
CT: control target
= control target key end

     0   :  { %9 = vsyncpa [#allocation3], 0  ;;  %s775_s0 = inlined_call_operand.vmem [shape: s32[8,1], index: 0, kind: input, shape index: {}]   ;;  %s776_s1 = inlined_call_operand.vmem [shape: s32[64,1], index: 1, kind: input, shape index: {}]   ;;  %s777_s2 = inlined_call_operand.vmem [shape: f32[64,128], index: 2, kind: input, shape index: {}]   ;;  %s778_s3 = inlined_call_operand.hbm [shape: f32[64,128], index: 3, kind: input, shape index: {}]   ;;  %s779_s4 = inlined_call_operand.hbm [shape: f32[8,8], index: 4, kind: output, shape index: {}]  }
   0x1   :  { %10 = vsyncpa [#allocation4], 0  ;;  %s21_s17 = sshll.u32 %s778_s3, 4  ;;  %s568_s18 = smov [#allocation2]   ;;  %s22_s17 = int_to_ptr.hbm [resolvable:$true] %s21_s17 }
   0x2   :  { %s23_s19 = sshll.u32 %s568_s18, 4  ;;  %s569_s20 = smov 128   ;;  %s24_s19 = int_to_ptr.vmem [resolvable:$true] %s23_s19 }
   0x3   :  { %s570_s21 = smov 8  }
   0x4   :  { %29 = dma.hbm_to_vmem [thread:$0]  %s22_s17, 1024, %s24_s19, [#allocation3], %s569_s20, %s569_s20, %s570_s21  }
   0x5   :  { %564 = dma.done.wait [#allocation3], 1024  }
   0x6   :  { %565 = vsyncadd [#allocation3], 4294966272  ;;  %v571_v0 = vmov 0   ;;  %v77_v1 = vld [vmem:[%s776_s1 + $0x18] sm:$0xff]  ;;  %v76_v2 = vld [vmem:[%s776_s1 + $0x10] sm:$0xff]  ;;  %v35_v27 = vlaneseq  ;;  %vm50_vm0 = vcmask 523264  }
   0x7   :  { %496 = vset.pattern.permute.xlu1 %v571_v0  ;;  %495 = vset.pattern.permute.xlu0 %v571_v0  ;;  %v80_v3 = vld [vmem:[%s776_s1 + $0x30] sm:$0xff]  ;;  %v79_v4 = vld [vmem:[%s776_s1 + $0x28] sm:$0xff]  ;;  %v74_v5 = vld [vmem:[%s776_s1] sm:$0xff]  ;;  %v572_v30 = vmov 0.0   ;;  %vm259_vm10 = vcmask 1041409   ;;  %vm261_vm11 = vcmask 1042434  }
   0x8   :  { %497 = vset.pattern.permute.xlu2 %v571_v0  ;;  %92 = vperm.xlu1 %496, %v77_v1   ;;  %v34_v6 = vld [vmem:[%s775_s0] sm:$0xff]  ;;  %v75_v8 = vld [vmem:[%s776_s1 + $0x8] sm:$0xff]  ;;  %v81_v9 = vld [vmem:[%s776_s1 + $0x38] sm:$0xff]  ;;  %v653_v28 = vand.u32 127, %v35_v27  ;;  %vm263_vm12 = vcmask 1043459   ;;  %vm265_vm13 = vcmask 1044484  }
   0x9   :  { %89 = vperm.xlu0 %495, %v76_v2   ;;  %101 = vperm.xlu2 %497, %v80_v3   ;;  %v78_v7 = vld [vmem:[%s776_s1 + $0x20] sm:$0xff]  ;;  %v129_v10 = vld [vmem:[#allocation2 + $0x38] sm:$0xff]  ;;  %v128_v12 = vld [vmem:[#allocation2 + $0x30] sm:$0xff]  ;;  %vm267_vm14 = vcmask 1045509   ;;  %vm269_vm15 = vcmask 1046534   ;;  %s454_s29 = sshll.u32 %s779_s4, 4  ;;  %s455_s29 = int_to_ptr.hbm [resolvable:$true] %s454_s29 }
   0xa   :  { %v49_v11 = vld [vmem:[%s777_s2 + $0x38] sm:$0xff]  ;;  %473 = vmatpush.msra.mxu2 %v129_v10  ;;  %v48_v13 = vld [vmem:[%s777_s2 + $0x30] sm:$0xff]  ;;  %v127_v14 = vld [vmem:[#allocation2 + $0x28] sm:$0xff]  ;;  %162 = vmatpush.msra.mxu1 %v129_v10 }
   0xb   :  { %62 = vmatpush.msra.mxu0 %v49_v11  ;;  %v47_v15 = vld [vmem:[%s777_s2 + $0x28] sm:$0xff]  ;;  %474 = vmatpush.msra.mxu3 %v129_v10  ;;  %v126_v16 = vld [vmem:[#allocation2 + $0x20] sm:$0xff]  ;;  %v125_v18 = vld [vmem:[#allocation2 + $0x18] sm:$0xff] }
   0xc   :  { %475 = vmatpush.msra.mxu2 %v128_v12  ;;  %163 = vmatpush.msra.mxu1 %v128_v12  ;;  %v46_v17 = vld [vmem:[%s777_s2 + $0x20] sm:$0xff]  ;;  %v45_v19 = vld [vmem:[%s777_s2 + $0x18] sm:$0xff]  ;;  %v124_v20 = vld [vmem:[#allocation2 + $0x10] sm:$0xff] }
   0xd   :  { %63 = vmatpush.msra.mxu0 %v48_v13  ;;  %476 = vmatpush.msra.mxu3 %v128_v12  ;;  %v44_v21 = vld [vmem:[%s777_s2 + $0x10] sm:$0xff]  ;;  %v123_v22 = vld [vmem:[#allocation2 + $0x8] sm:$0xff]  ;;  %v122_v24 = vld [vmem:[#allocation2] sm:$0xff] }
   0xe   :  { %477 = vmatpush.msra.mxu2 %v127_v14  ;;  %164 = vmatpush.msra.mxu1 %v127_v14  ;;  %v43_v23 = vld [vmem:[%s777_s2 + $0x8] sm:$0xff]  ;;  %v42_v25 = vld [vmem:[%s777_s2] sm:$0xff]  ;;  %s573_s2 = smov [#allocation5]  }
   0xf   :  { %64 = vmatpush.msra.mxu0 %v47_v15  ;;  %478 = vmatpush.msra.mxu3 %v127_v14  ;;  %s452_s26 = sshll.u32 %s573_s2, 4  ;;  %s453_s26 = int_to_ptr.vmem [resolvable:$true] %s452_s26 }
  0x10   :  { %83 = vperm.xlu1 %496, %v74_v5   ;;  %479 = vmatpush.msra.mxu2 %v126_v16 }
  0x11   :  { %98 = vperm.xlu0 %495, %v79_v4   ;;  %38 = vperm.xlu2 %497, %v34_v6  }
  0x12   :  { %65 = vmatpush.msra.mxu0 %v46_v17  ;;  %165 = vmatpush.msra.mxu1 %v126_v16 }
  0x13   :  { %480 = vmatpush.msra.mxu3 %v126_v16  ;;  %481 = vmatpush.msra.mxu2 %v125_v18 }
  0x14   :  { %66 = vmatpush.msra.mxu0 %v45_v19  ;;  %166 = vmatpush.msra.mxu1 %v125_v18 }
  0x15   :  { %482 = vmatpush.msra.mxu3 %v125_v18  ;;  %483 = vmatpush.msra.mxu2 %v124_v20 }
  0x16   :  { %67 = vmatpush.msra.mxu0 %v44_v21  ;;  %167 = vmatpush.msra.mxu1 %v124_v20 }
  0x17   :  { %484 = vmatpush.msra.mxu3 %v124_v20  ;;  %485 = vmatpush.msra.mxu2 %v123_v22 }
  0x18   :  { %86 = vperm.xlu1 %496, %v75_v8   ;;  %168 = vmatpush.msra.mxu1 %v123_v22 }
  0x19   :  { %95 = vperm.xlu0 %495, %v78_v7   ;;  %104 = vperm.xlu2 %497, %v81_v9  }
  0x1a   :  { %486 = vmatpush.msra.mxu3 %v123_v22  ;;  %68 = vmatpush.msra.mxu0 %v43_v23 }
  0x1b   :  { %487 = vmatpush.msra.mxu2 %v122_v24  ;;  %169 = vmatpush.msra.mxu1 %v122_v24 }
  0x1c   :  { %69 = vmatpush.msra.mxu0 %v42_v25  ;;  %488 = vmatpush.msra.mxu3 %v122_v24 }
  0x63   :  { %v102_v26 = vpop.permute.xlu2 %101 }
  0x64   :  { %vm112_vm6 = vcmp.eq.s32.totalorder %v653_v28, %v102_v26 }
  0x65   :  { %v120_v44 = vsel %vm112_vm6, 1.0, %v572_v30 }
  0x6b   :  { %v39_v29 = vpop.permute.xlu2 %38 }
  0x6c   :  { %vm40_vm1 = vcmp.eq.s32.totalorder %v653_v28, %v39_v29 }
  0x6d   :  { %v41_v31 = vsel %vm40_vm1, 1.0, %v572_v30  ;;  %vm274_vm1 = vcmask 64512  }
  0x6e   :  { %464 = vmatmul.msk.f32.vlgmr.msra.gmra.mxu0 %vm50_vm0, %v41_v31 }
  0x73   :  { %v105_v45 = vpop.permute.xlu2 %104 }
  0x74   :  { %vm113_vm9 = vcmp.eq.s32.totalorder %v653_v28, %v105_v45 }
  0x75   :  { %v121_v46 = vsel %vm113_vm9, 1.0, %v572_v30 }
  0x7a   :  { %v93_v32 = vpop.permute.xlu1 %92 }
  0x7b   :  { %v90_v33 = vpop.permute.xlu0 %89  ;;  %vm109_vm3 = vcmp.eq.s32.totalorder %v653_v28, %v93_v32 }
  0x7c   :  { %vm108_vm2 = vcmp.eq.s32.totalorder %v653_v28, %v90_v33  ;;  %v117_v37 = vsel %vm109_vm3, 1.0, %v572_v30 }
  0x7d   :  { %v116_v34 = vsel %vm108_vm2, 1.0, %v572_v30 }
  0x7e   :  { %467 = vmatmul.msk.f32.vlgmr.msra.gmra.mxu2 %vm50_vm0, %v116_v34 }
  0x82   :  { %v84_v36 = vpop.permute.xlu1 %83 }
  0x83   :  { %v99_v35 = vpop.permute.xlu0 %98  ;;  %vm106_vm5 = vcmp.eq.s32.totalorder %v653_v28, %v84_v36 }
  0x84   :  { %vm111_vm4 = vcmp.eq.s32.totalorder %v653_v28, %v99_v35  ;;  %v114_v39 = vsel %vm106_vm5, 1.0, %v572_v30 }
  0x85   :  { %v119_v38 = vsel %vm111_vm4, 1.0, %v572_v30  ;;  %465 = vmatmul.msk.f32.vlgmr.msra.gmra.mxu1 %vm50_vm0, %v114_v39 }
  0x86   :  { %468 = vmatmul.msk.f32.gmra.mxu2 %vm50_vm0, %v117_v37  ;;  %470 = vmatmul.msk.f32.vlgmr.msra.gmra.mxu3 %vm50_vm0, %v119_v38 }
  0x8a   :  { %v87_v41 = vpop.permute.xlu1 %86 }
  0x8b   :  { %v96_v40 = vpop.permute.xlu0 %95  ;;  %vm107_vm8 = vcmp.eq.s32.totalorder %v653_v28, %v87_v41 }
  0x8c   :  { %vm110_vm7 = vcmp.eq.s32.totalorder %v653_v28, %v96_v40  ;;  %v115_v43 = vsel %vm107_vm8, 1.0, %v572_v30 }
  0x8d   :  { %v118_v42 = vsel %vm110_vm7, 1.0, %v572_v30  ;;  %466 = vmatmul.msk.f32.gmra.mxu1 %vm50_vm0, %v115_v43 }
  0x8e   :  { %469 = vmatmul.msk.f32.gmra.mxu2 %vm50_vm0, %v118_v42  ;;  %471 = vmatmul.msk.f32.gmra.mxu3 %vm50_vm0, %v120_v44 }
  0x96   :  { %472 = vmatmul.msk.f32.gmra.mxu3 %vm50_vm0, %v121_v46  ;;  %vm271_vm0 = vcmask 1047559  }
  0xeb   :  { %v71_v47 = vpop.f32.mrf.mxu0 }
  0xec   :  { %v197_v48 = vrot.slane %v71_v47, 2  ;;  %v203_v52 = vperm.slane %v71_v47, 0  ;;  %v198_v55 = vrot.slane %v71_v47, 3  ;;  %v196_v56 = vrot.slane %v71_v47, 1 }
  0xed   :  { %v199_v0 = vrot.slane %v71_v47, 4  ;;  %v201_v1 = vrot.slane %v71_v47, 6  ;;  %v200_v2 = vrot.slane %v71_v47, 5  ;;  %v202_v11 = vrot.slane %v71_v47, 7 }
  0xee   :  { %v205_v49 = vperm.slane %v197_v48, 0  ;;  %v206_v57 = vperm.slane %v198_v55, 0  ;;  %v204_v61 = vperm.slane %v196_v56, 0 }
  0xef   :  { %v207_v3 = vperm.slane %v199_v0, 0  ;;  %v209_v5 = vperm.slane %v201_v1, 0  ;;  %v208_v6 = vperm.slane %v200_v2, 0  ;;  %v210_v12 = vperm.slane %v202_v11, 0 }
 0x101   :  { %v177_v50 = vpop.f32.mrf.mxu2 }
 0x102   :  { %v221_v51 = vmul.f32 %v205_v49, %v177_v50  ;;  %v171_v53 = vpop.f32.mrf.mxu1 }
 0x103   :  { %v219_v54 = vmul.f32 %v203_v52, %v171_v53 }
 0x104   :  { %231 = vadd.xlane.f32.xlu2 %v221_v51 }
 0x105   :  { %227 = vadd.xlane.f32.xlu0 %v219_v54 }
 0x109   :  { %v180_v58 = vpop.f32.mrf.mxu2  ;;  %v186_v60 = vpop.f32.mrf.mxu3 }
 0x10a   :  { %v222_v59 = vmul.f32 %v206_v57, %v180_v58  ;;  %v174_v62 = vpop.f32.mrf.mxu1  ;;  %v224_v10 = vmul.f32 %v208_v6, %v186_v60 }
 0x10b   :  { %v220_v63 = vmul.f32 %v204_v61, %v174_v62 }
 0x10c   :  { %233 = vadd.xlane.f32.xlu2 %v222_v59 }
 0x10d   :  { %229 = vadd.xlane.f32.xlu1 %v220_v63 }
 0x111   :  { %v183_v4 = vpop.f32.mrf.mxu2  ;;  %v189_v8 = vpop.f32.mrf.mxu3 }
 0x112   :  { %v223_v7 = vmul.f32 %v207_v3, %v183_v4  ;;  %v225_v9 = vmul.f32 %v209_v5, %v189_v8 }
 0x114   :  { %235 = vadd.xlane.f32.xlu0 %v223_v7  ;;  %239 = vadd.xlane.f32.xlu2 %v225_v9 }
 0x115   :  { %237 = vadd.xlane.f32.xlu1 %v224_v10 }
 0x119   :  { %v192_v13 = vpop.f32.mrf.mxu3 }
 0x11a   :  { %v226_v14 = vmul.f32 %v210_v12, %v192_v13 }
 0x11c   :  { %241 = vadd.xlane.f32.xlu0 %v226_v14 }
 0x177   :  { %v673_v15 = vpop.xlane.xlu2 %231 }
 0x178   :  { %v675_v16 = vpop.xlane.xlu0 %227  ;;  %v253_v22 = vperm.slane %v673_v15, %v653_v28 }
 0x179   :  { %v251_v19 = vperm.slane %v675_v16, %v653_v28 }
 0x17f   :  { %v683_v20 = vpop.xlane.xlu2 %233 }
 0x180   :  { %v677_v17 = vpop.xlane.xlu1 %229  ;;  %v254_v26 = vperm.slane %v683_v20, %v653_v28 }
 0x181   :  { %v252_v18 = vperm.slane %v677_v17, %v653_v28 }
 0x183   :  { %v260_v21 = vsel %vm259_vm10, %v252_v18, %v251_v19 }
 0x184   :  { %v262_v24 = vsel %vm261_vm11, %v253_v22, %v260_v21 }
 0x185   :  { %v264_v29 = vsel %vm263_vm12, %v254_v26, %v262_v24 }
 0x187   :  { %v688_v23 = vpop.xlane.xlu0 %235  ;;  %v701_v32 = vpop.xlane.xlu2 %239 }
 0x188   :  { %v255_v25 = vperm.slane %v688_v23, %v653_v28  ;;  %v695_v27 = vpop.xlane.xlu1 %237  ;;  %v257_v34 = vperm.slane %v701_v32, %v653_v28 }
 0x189   :  { %v256_v30 = vperm.slane %v695_v27, %v653_v28 }
 0x18a   :  { %v266_v31 = vsel %vm265_vm13, %v255_v25, %v264_v29 }
 0x18b   :  { %v268_v33 = vsel %vm267_vm14, %v256_v30, %v266_v31 }
 0x18c   :  { %v270_v37 = vsel %vm269_vm15, %v257_v34, %v268_v33 }
 0x18f   :  { %v706_v35 = vpop.xlane.xlu0 %241 }
 0x190   :  { %v258_v36 = vperm.slane %v706_v35, %v653_v28 }
 0x192   :  { %v272_v38 = vsel %vm271_vm0, %v258_v36, %v270_v37 }
 0x193   :  { %v275_v39 = vsel %vm274_vm1, %v272_v38, -inf }
 0x194   :  { %276 = vmax.xlane.f32.xlu1 %v275_v39 }
 0x207   :  { %v713_v40 = vpop.xlane.xlu1 %276 }
 0x208   :  { %v281_v41 = vperm.slane %v713_v40, 2  ;;  %v280_v42 = vperm.slane %v713_v40, 1  ;;  %v279_v43 = vperm.slane %v713_v40, 0  ;;  %v284_v47 = vperm.slane %v713_v40, 5 }
 0x209   :  { %v282_v48 = vperm.slane %v713_v40, 3  ;;  %v283_v49 = vperm.slane %v713_v40, 4  ;;  %v285_v58 = vperm.slane %v713_v40, 6  ;;  %v286_v61 = vperm.slane %v713_v40, 7 }
 0x20a   :  { %v297_v44 = vsub.f32 %v673_v15, %v281_v41  ;;  %v296_v45 = vsub.f32 %v677_v17, %v280_v42  ;;  %v295_v46 = vsub.f32 %v675_v16, %v279_v43  ;;  %v300_v53 = vsub.f32 %v695_v27, %v284_v47 }
 0x20b   :  { %v298_v54 = vsub.f32 %v683_v20, %v282_v48  ;;  %v299_v55 = vsub.f32 %v688_v23, %v283_v49  ;;  %v301_v0 = vsub.f32 %v701_v32, %v285_v58  ;;  %v302_v1 = vsub.f32 %v706_v35, %v286_v61 }
 0x20c   :  { %v307_v50 = vmul.f32 1.442695, %v297_v44  ;;  %v305_v51 = vmul.f32 1.442695, %v296_v45  ;;  %v303_v52 = vmul.f32 1.442695, %v295_v46 }
 0x20d   :  { %v313_v56 = vmul.f32 1.442695, %v300_v53  ;;  %v309_v57 = vmul.f32 1.442695, %v298_v54  ;;  %v311_v60 = vmul.f32 1.442695, %v299_v55 }
 0x20e   :  { %498 = vpow2.f32 %v307_v50  ;;  %v315_v2 = vmul.f32 1.442695, %v301_v0  ;;  %v317_v4 = vmul.f32 1.442695, %v302_v1 }
 0x20f   :  { %500 = vpow2.f32 %v305_v51 }
 0x210   :  { %502 = vpow2.f32 %v303_v52 }
 0x211   :  { %504 = vpow2.f32 %v313_v56 }
 0x212   :  { %506 = vpow2.f32 %v309_v57 }
 0x213   :  { %508 = vpow2.f32 %v311_v60 }
 0x214   :  { %v499_v59 = vpop.eup %498  ;;  %510 = vpow2.f32 %v315_v2 }
 0x215   :  { %v501_v62 = vpop.eup %500  ;;  %334 = vperm.xlu1 %496, %v499_v59   ;;  %512 = vpow2.f32 %v317_v4 }
 0x216   :  { %v503_v63 = vpop.eup %502  ;;  %331 = vperm.xlu0 %495, %v501_v62  }
 0x217   :  { %328 = vperm.xlu2 %497, %v503_v63   ;;  %v505_v3 = vpop.eup %504 }
 0x218   :  { %v507_v5 = vpop.eup %506 }
 0x219   :  { %v509_v6 = vpop.eup %508 }
 0x21a   :  { %v511_v7 = vpop.eup %510 }
 0x21b   :  { %v513_v8 = vpop.eup %512 }
 0x21d   :  { %343 = vperm.xlu1 %496, %v505_v3  }
 0x21e   :  { %337 = vperm.xlu0 %495, %v507_v5  }
 0x21f   :  { %340 = vperm.xlu2 %497, %v509_v6  }
 0x226   :  { %346 = vperm.xlu0 %495, %v511_v7  }
 0x227   :  { %349 = vperm.xlu2 %497, %v513_v8  }
 0x271   :  { %v329_v9 = vpop.permute.xlu2 %328 }
 0x272   :  { %v351_v14 = vperm.slane %v329_v9, %v653_v28 }
 0x279   :  { %v341_v13 = vpop.permute.xlu2 %340 }
 0x27a   :  { %v355_v26 = vperm.slane %v341_v13, %v653_v28 }
 0x281   :  { %v350_v30 = vpop.permute.xlu2 %349 }
 0x282   :  { %v358_v37 = vperm.slane %v350_v30, %v653_v28 }
 0x287   :  { %v335_v11 = vpop.permute.xlu1 %334 }
 0x288   :  { %v332_v10 = vpop.permute.xlu0 %331  ;;  %v353_v18 = vperm.slane %v335_v11, %v653_v28 }
 0x289   :  { %v352_v12 = vperm.slane %v332_v10, %v653_v28 }
 0x28b   :  { %v359_v19 = vsel %vm259_vm10, %v352_v12, %v351_v14 }
 0x28c   :  { %v360_v24 = vsel %vm261_vm11, %v353_v18, %v359_v19 }
 0x28f   :  { %v344_v29 = vpop.permute.xlu1 %343 }
 0x290   :  { %v338_v21 = vpop.permute.xlu0 %337  ;;  %v356_v33 = vperm.slane %v344_v29, %v653_v28 }
 0x291   :  { %v354_v22 = vperm.slane %v338_v21, %v653_v28 }
 0x293   :  { %v361_v25 = vsel %vm263_vm12, %v354_v22, %v360_v24 }
 0x294   :  { %v362_v31 = vsel %vm265_vm13, %v355_v26, %v361_v25 }
 0x295   :  { %v363_v38 = vsel %vm267_vm14, %v356_v33, %v362_v31 }
 0x298   :  { %v347_v34 = vpop.permute.xlu0 %346 }
 0x299   :  { %v357_v36 = vperm.slane %v347_v34, %v653_v28 }
 0x29b   :  { %v364_v39 = vsel %vm269_vm15, %v357_v36, %v363_v38 }
 0x29c   :  { %v365_v41 = vsel %vm271_vm0, %v358_v37, %v364_v39 }
 0x29d   :  { %v367_v42 = vsel %vm274_vm1, %v365_v41, 0.0 }
 0x29e   :  { %368 = vadd.xlane.f32.xlu1 %v367_v42 }
 0x311   :  { %v369_v43 = vpop.xlane.xlu1 %368 }
 0x312   :  { %514 = vlog2.f32 %v369_v43 }
 0x318   :  { %v515_v44 = vpop.eup %514 }
 0x319   :  { %v371_v45 = vmul.f32 0.6931472, %v515_v44 }
 0x31b   :  { %v372_v46 = vadd.f32 %v371_v45, %v713_v40 }
 0x31d   :  { %v375_v47 = vperm.slane %v372_v46, 1  ;;  %v374_v48 = vperm.slane %v372_v46, 0  ;;  %v377_v51 = vperm.slane %v372_v46, 3  ;;  %v376_v52 = vperm.slane %v372_v46, 2 }
 0x31e   :  { %v379_v55 = vperm.slane %v372_v46, 5  ;;  %v378_v56 = vperm.slane %v372_v46, 4 }
 0x31f   :  { %v391_v49 = vsub.f32 %v677_v17, %v375_v47  ;;  %v390_v50 = vsub.f32 %v675_v16, %v374_v48  ;;  %v393_v53 = vsub.f32 %v683_v20, %v377_v51  ;;  %v392_v54 = vsub.f32 %v673_v15, %v376_v52 }
 0x320   :  { %v395_v40 = vsub.f32 %v695_v27, %v379_v55  ;;  %v394_v57 = vsub.f32 %v688_v23, %v378_v56  ;;  %v381_v17 = vperm.slane %v372_v46, 7  ;;  %v380_v16 = vperm.slane %v372_v46, 6 }
 0x321   :  { %410 = vperm.xlu2 %497, %v391_v49   ;;  %407 = vperm.xlu0 %495, %v390_v50  }
 0x322   :  { %v397_v58 = vsub.f32 %v706_v35, %v381_v17  ;;  %v396_v59 = vsub.f32 %v701_v32, %v380_v16 }
 0x329   :  { %416 = vperm.xlu2 %497, %v393_v53   ;;  %413 = vperm.xlu0 %495, %v392_v54  }
 0x331   :  { %422 = vperm.xlu2 %497, %v395_v40   ;;  %419 = vperm.xlu0 %495, %v394_v57  }
 0x339   :  { %428 = vperm.xlu2 %497, %v397_v58   ;;  %425 = vperm.xlu0 %495, %v396_v59  }
 0x37b   :  { %v411_v20 = vpop.permute.xlu2 %410 }
 0x37c   :  { %v431_v23 = vperm.slane %v411_v20, %v653_v28 }
 0x383   :  { %v417_v60 = vpop.permute.xlu2 %416 }
 0x384   :  { %v433_v2 = vperm.slane %v417_v60, %v653_v28 }
 0x38b   :  { %v423_v62 = vpop.permute.xlu2 %422 }
 0x38c   :  { %v435_v6 = vperm.slane %v423_v62, %v653_v28 }
 0x393   :  { %v408_v15 = vpop.permute.xlu0 %407  ;;  %v429_v4 = vpop.permute.xlu2 %428 }
 0x394   :  { %v430_v63 = vperm.slane %v408_v15, %v653_v28  ;;  %v437_v9 = vperm.slane %v429_v4, %v653_v28 }
 0x396   :  { %v438_v1 = vsel %vm259_vm10, %v431_v23, %v430_v63 }
 0x39b   :  { %v414_v61 = vpop.permute.xlu0 %413 }
 0x39c   :  { %v432_v27 = vperm.slane %v414_v61, %v653_v28 }
 0x39e   :  { %v439_v35 = vsel %vm261_vm11, %v432_v27, %v438_v1 }
 0x39f   :  { %v440_v3 = vsel %vm263_vm12, %v433_v2, %v439_v35 }
 0x3a3   :  { %v420_v0 = vpop.permute.xlu0 %419 }
 0x3a4   :  { %v434_v32 = vperm.slane %v420_v0, %v653_v28 }
 0x3a6   :  { %v441_v5 = vsel %vm265_vm13, %v434_v32, %v440_v3 }
 0x3a7   :  { %v442_v10 = vsel %vm267_vm14, %v435_v6, %v441_v5 }
 0x3ab   :  { %v426_v7 = vpop.permute.xlu0 %425 }
 0x3ac   :  { %v436_v8 = vperm.slane %v426_v7, %v653_v28 }
 0x3ae   :  { %v443_v11 = vsel %vm269_vm15, %v436_v8, %v442_v10 }
 0x3af   :  { %v444_v12 = vsel %vm271_vm0, %v437_v9, %v443_v11 }
 0x3b0   :  { %446 = vst.msk [vmem:[#allocation5] sm:$0xff] %vm274_vm1, %v444_v12 }
 0x3b1   :  { %457 = dma.vmem_to_hbm [thread:$0]  %s453_s26, 128, %s455_s29, [#allocation4]  }
 0x3b2   :  { %566 = dma.done.wait [#allocation4], 128  }
 0x3b3   :  { %567 = vsyncadd [#allocation4], 4294967168 }
 0x3b4   :  { %462 = vsyncpa [#allocation3], 1 }
 0x3b5   :  { %463 = vsyncpa [#allocation4], 1 }

</bundles_post_ra>
